<compile_context>
chip_gen: v5e
topology: v5e:2x2
jax: 0.10.0
libtpu: 0.0.40
codegen_flags: <defaults>
</compile_context>

<pallas_src>
import functools

import jax
import jax.numpy as jnp
from jax import lax
from jax.experimental import pallas as pl
from jax.experimental.pallas import tpu as pltpu


def _yolo_kernel(x_ref, grid_ref, anch_ref, o_ref, *, stride: float):
    # x_ref   : (Ab, CH, S_tile)  raw predictions, CH = min(8, nC+5); S on lanes
    # grid_ref: (1, 2, S_tile)    row 0 = grid_x (col idx j), row 1 = grid_y (row idx i)
    # anch_ref: (Ab, 2, 1)        per-plane anchor (w, h) in pixels
    # o_ref   : (Ab, CH, S_tile)  aliased with the input buffer
    x = x_ref[...].astype(jnp.float32)
    g = grid_ref[...].astype(jnp.float32)        # (1, 2, S_tile)
    a = anch_ref[...].astype(jnp.float32)        # (Ab, 2, 1)

    gx = g[:, 0:1, :]                            # (1, 1, S_tile)
    gy = g[:, 1:2, :]
    aw = a[:, 0:1, :]                            # (Ab, 1, 1)
    ah = a[:, 1:2, :]

    # channel index inside the slab (sublane iota); only channels 0..4 are
    # transformed, channels 5..CH-1 (class logits) pass through unchanged.
    c = lax.broadcasted_iota(jnp.int32, x.shape, 1)

    sig = jax.nn.sigmoid(x)
    ex = jnp.exp(x)

    out = x                                              # c >= 5 : raw class logits
    out = jnp.where(c == 0, (sig + gx) * stride, out)    # x-center in pixels
    out = jnp.where(c == 1, (sig + gy) * stride, out)    # y-center in pixels
    out = jnp.where(c == 2, ex * aw, out)                # width  = exp(tw) * anchor_w
    out = jnp.where(c == 3, ex * ah, out)                # height = exp(th) * anchor_h
    out = jnp.where(c == 4, sig, out)                    # objectness -> sigmoid
    o_ref[...] = out.astype(o_ref.dtype)


def _round_up(v, m):
    return (v + m - 1) // m * m


def _pick_tiles(P, c5, S, itemsize, io_budget_bytes=8 * 1024 * 1024):
    """Pick (plane-block size Ab, spatial tile S_tile).

    Accounts for in+out blocks, the 2x pipeline double-buffering, and the tiny
    grid/anchor side inputs.  Guarantees >= 2 grid steps whenever P >= 2 so the
    second TensorCore on v7x is not left idle.
    """
    ch_pad = _round_up(min(8, c5), 8)

    def io_bytes(ab, s_tile):
        s_pad = _round_up(s_tile, 128)
        x_blocks = ab * ch_pad * s_pad * itemsize * 2 * 2   # in + out, double-buffered
        grid_blk = 8 * s_pad * 4 * 2                        # (1,2,s_tile) f32, 2 buffers
        anch_blk = ab * 8 * 128 * 4 * 2                     # (Ab,2,1) padded, 2 buffers
        return x_blocks + grid_blk + anch_blk

    # Spatial tile: full S unless a single plane blows the budget (huge nG), or
    # P == 1 and we still want >= 2 grid steps.
    s_tile = S
    if io_bytes(1, S) > io_budget_bytes:
        s_tile = 128
        while s_tile + 128 < S and io_bytes(1, s_tile + 128) <= io_budget_bytes:
            s_tile += 128
    elif P == 1 and S > 256:
        s_tile = _round_up((S + 1) // 2, 128)

    n_sb = -(-S // s_tile)

    # Plane block: largest divisor of P that fits the budget; when there is only
    # one spatial block, cap at P//2 so the grid has at least 2 steps.
    cap = P if (n_sb >= 2 or P < 2) else max(1, P // 2)
    ab = 1
    for d in range(1, P + 1):
        if P % d == 0 and d <= cap and io_bytes(d, s_tile) <= io_budget_bytes:
            ab = d
    return ab, s_tile


def yolo_forward(p, img_size, anchors, nC):
    """Inference decode of a YOLO head. p: (bs, nA*(nC+5), nG, nG)."""
    anchors = jnp.asarray(anchors, jnp.float32)
    nA = anchors.shape[0]
    c5 = nC + 5
    bs = p.shape[0]
    nG = p.shape[-1]
    assert p.shape == (bs, nA * c5, nG, nG), p.shape
    stride = float(img_size) / float(nG)

    S = nG * nG
    P = bs * nA
    CH = min(8, c5)          # channels 0..4 need work; pad to one sublane row

    # lane-dense, channels-on-sublanes layout; contiguous (free) reshape.
    x = p.reshape(P, c5, S)

    # grid offsets per flattened spatial index s = i*nG + j:
    #   gx[s] = j (s % nG), gy[s] = i (s // nG)  -- precomputed in XLA, tiny input.
    jj = jnp.tile(jnp.arange(nG, dtype=jnp.float32), nG)
    ii = jnp.repeat(jnp.arange(nG, dtype=jnp.float32), nG)
    grid_xy = jnp.stack([jj, ii], axis=0)[None]           # (1, 2, S)

    # per-(batch, anchor) plane anchors in pixels (anchor_vec * stride == anchors).
    anch = jnp.tile(anchors, (bs, 1)).reshape(P, 2, 1)

    Ab, S_TILE = _pick_tiles(P, c5, S, jnp.dtype(p.dtype).itemsize)
    n_pb = P // Ab
    n_sb = pl.cdiv(S, S_TILE)

    kernel = functools.partial(_yolo_kernel, stride=stride)
    y = pl.pallas_call(
        kernel,
        out_shape=jax.ShapeDtypeStruct((P, c5, S), p.dtype),
        grid_spec=pltpu.PrefetchScalarGridSpec(
            num_scalar_prefetch=0,
            # s outer / plane inner: the grid-offset block index is unchanged
            # across consecutive steps, so its DMA is elided by the pipeliner.
            grid=(n_sb, n_pb),
            in_specs=[
                pl.BlockSpec((Ab, CH, S_TILE), lambda s, i: (i, 0, s)),
                pl.BlockSpec((1, 2, S_TILE), lambda s, i: (0, 0, s)),
                pl.BlockSpec((Ab, 2, 1), lambda s, i: (i, 0, 0)),
            ],
            out_specs=pl.BlockSpec((Ab, CH, S_TILE), lambda s, i: (i, 0, s)),
        ),
        # Donate x: channels >= 8 (class logits) never move through the kernel;
        # they stay in the aliased buffer untouched.
        input_output_aliases={0: 0},
        compiler_params=pltpu.CompilerParams(
            dimension_semantics=("parallel", "parallel"),
            vmem_limit_bytes=32 * 1024 * 1024,
        ),
    )(x, grid_xy, anch)

    # match PyTorch: view(bs, nA, c5, nG, nG).permute(0,1,3,4,2).view(bs, -1, 5+nC)
    # (pure layout plumbing done once in XLA; see TODO at top about fusing it for
    # large-c5 heads).
    out = y.reshape(bs, nA, c5, nG, nG).transpose(0, 1, 3, 4, 2)
    return out.reshape(bs, nA * nG * nG, c5)


class YOLOLayer:
    """JAX/Pallas mirror of the PyTorch YOLOLayer (inference decode path)."""

    def __init__(self, anchors, nC, img_size, yolo_layer, cfg):
        self.anchors = jnp.asarray(anchors, jnp.float32)
        self.nA = self.anchors.shape[0]
        self.nC = nC
        # TODO(synk): training-loss branch (targets is not None: build_targets +
        # MSE/BCE/CE losses) and the ONNX_EXPORT branch are not implemented.

    def __call__(self, p, img_size, targets=None, var=None):
        assert targets is None, "training-loss path not implemented"
        return yolo_forward(p, img_size, self.anchors, self.nC)


def _reference_yolo(p, img_size, anchors, nC):
    # pure-JAX reference mirroring the PyTorch forward (inference branch)
    bs, _, nG, _ = p.shape
    anchors = jnp.asarray(anchors, jnp.float32)
    nA = anchors.shape[0]
    c5 = nC + 5
    stride = img_size / nG
    p5 = p.reshape(bs, nA, c5, nG, nG).transpose(0, 1, 3, 4, 2)      # (bs,nA,nG,nG,c5)
    gx = jnp.broadcast_to(jnp.arange(nG, dtype=p.dtype), (nG, nG))   # [i, j] = j
    gy = gx.T                                                        # [i, j] = i
    grid_xy = jnp.stack([gx, gy], axis=-1)                           # (nG, nG, 2)
    anchor_wh = (anchors / stride).reshape(1, nA, 1, 1, 2)
    xy = (jax.nn.sigmoid(p5[..., 0:2]) + grid_xy) * stride
    wh = jnp.exp(p5[..., 2:4]) * anchor_wh * stride
    conf = jax.nn.sigmoid(p5[..., 4:5])
    cls = p5[..., 5:]
    out = jnp.concatenate([xy, wh, conf, cls], axis=-1)
    return out.reshape(bs, nA * nG * nG, c5)


if __name__ == "__main__":
    key = jax.random.PRNGKey(0)
    bs, nA, nC, nG = 2, 3, 4, 16
    img_size = 512
    anchors = [[10.0, 13.0], [16.0, 30.0], [33.0, 23.0]]

    p = jax.random.normal(key, (bs, nA * (nC + 5), nG, nG), dtype=jnp.float32)

    layer = YOLOLayer(anchors, nC, img_size, yolo_layer=0, cfg="cfg/yolov3.cfg")
    fwd = jax.jit(lambda t: layer(t, img_size))
    out = jax.block_until_ready(fwd(p))

    ref = _reference_yolo(p, img_size, anchors, nC)
    assert out.shape == (bs, nA * nG * nG, nC + 5), out.shape
    assert out.dtype == p.dtype
    assert jnp.allclose(out, ref, rtol=1e-5, atol=1e-5), "mismatch vs reference YOLO decode"

    print("KERNEL_OK")
</pallas_src>

<mosaic_0001>
module attributes {stable_mosaic.version = 11 : i64} {
  func.func @_yolo_kernel(%arg0: i32, %arg1: i32, %arg2: memref<3x8x256xf32, #tpu.memory_space<vmem>>, %arg3: memref<1x2x256xf32, #tpu.memory_space<vmem>>, %arg4: memref<3x2x1xf32, #tpu.memory_space<vmem>>, %arg5: memref<3x8x256xf32, #tpu.memory_space<vmem>>) attributes {dimension_semantics = [#tpu.dimension_semantics<parallel>, #tpu.dimension_semantics<parallel>], iteration_bounds = array<i64: 1, 2>, scalar_prefetch = 0 : i64, scratch_operands = 0 : i64, tpu.core_type = #tpu.core_type<tc>, window_params = [{transform_indices = @transform_0, window_bounds = array<i64: 3, 8, 256>}, {transform_indices = @transform_1, window_bounds = array<i64: 1, 2, 256>}, {transform_indices = @transform_2, window_bounds = array<i64: 3, 2, 1>}, {transform_indices = @transform_3, window_bounds = array<i64: 3, 8, 256>}]} {
    %c0 = arith.constant 0 : index
    %c0_0 = arith.constant 0 : index
    %c0_1 = arith.constant 0 : index
    %0 = vector.load %arg2[%c0, %c0_0, %c0_1] : memref<3x8x256xf32, #tpu.memory_space<vmem>>, vector<3x8x256xf32>
    %c0_2 = arith.constant 0 : index
    %c0_3 = arith.constant 0 : index
    %c0_4 = arith.constant 0 : index
    %1 = vector.load %arg3[%c0_2, %c0_3, %c0_4] : memref<1x2x256xf32, #tpu.memory_space<vmem>>, vector<1x2x256xf32>
    %c0_5 = arith.constant 0 : index
    %c0_6 = arith.constant 0 : index
    %c0_7 = arith.constant 0 : index
    %2 = vector.load %arg4[%c0_5, %c0_6, %c0_7] : memref<3x2x1xf32, #tpu.memory_space<vmem>>, vector<3x2x1xf32>
    %3 = vector.extract_strided_slice %1 {offsets = [0, 0, 0], sizes = [1, 1, 256], strides = [1, 1, 1]} : vector<1x2x256xf32> to vector<1x1x256xf32>
    %4 = vector.extract_strided_slice %1 {offsets = [0, 1, 0], sizes = [1, 1, 256], strides = [1, 1, 1]} : vector<1x2x256xf32> to vector<1x1x256xf32>
    %5 = vector.extract_strided_slice %2 {offsets = [0, 0, 0], sizes = [3, 1, 1], strides = [1, 1, 1]} : vector<3x2x1xf32> to vector<3x1x1xf32>
    %6 = vector.extract_strided_slice %2 {offsets = [0, 1, 0], sizes = [3, 1, 1], strides = [1, 1, 1]} : vector<3x2x1xf32> to vector<3x1x1xf32>
    %7 = tpu.iota {dimensions = array<i32: 1>} : vector<3x8x256xi32>
    %8 = arith.negf %0 : vector<3x8x256xf32>
    %9 = math.exp %8 : vector<3x8x256xf32>
    %cst = arith.constant 1.000000e+00 : f32
    %10 = vector.broadcast %cst : f32 to vector<3x8x256xf32>
    %11 = arith.addf %10, %9 : vector<3x8x256xf32>
    %12 = arith.divf %10, %11 : vector<3x8x256xf32>
    %13 = math.exp %0 : vector<3x8x256xf32>
    %c0_i32 = arith.constant 0 : i32
    %14 = vector.broadcast %c0_i32 : i32 to vector<3x8x256xi32>
    %15 = arith.cmpi eq, %7, %14 : vector<3x8x256xi32>
    %16 = vector.broadcast %3 : vector<1x1x256xf32> to vector<3x8x256xf32>
    %17 = arith.addf %12, %16 : vector<3x8x256xf32>
    %cst_8 = arith.constant 3.200000e+01 : f32
    %18 = vector.broadcast %cst_8 : f32 to vector<3x8x256xf32>
    %19 = arith.mulf %17, %18 : vector<3x8x256xf32>
    %20 = arith.select %15, %19, %0 : vector<3x8x256xi1>, vector<3x8x256xf32>
    %c1_i32 = arith.constant 1 : i32
    %21 = vector.broadcast %c1_i32 : i32 to vector<3x8x256xi32>
    %22 = arith.cmpi eq, %7, %21 : vector<3x8x256xi32>
    %23 = vector.broadcast %4 : vector<1x1x256xf32> to vector<3x8x256xf32>
    %24 = arith.addf %12, %23 : vector<3x8x256xf32>
    %cst_9 = arith.constant 3.200000e+01 : f32
    %25 = vector.broadcast %cst_9 : f32 to vector<3x8x256xf32>
    %26 = arith.mulf %24, %25 : vector<3x8x256xf32>
    %27 = arith.select %22, %26, %20 : vector<3x8x256xi1>, vector<3x8x256xf32>
    %c2_i32 = arith.constant 2 : i32
    %28 = vector.broadcast %c2_i32 : i32 to vector<3x8x256xi32>
    %29 = arith.cmpi eq, %7, %28 : vector<3x8x256xi32>
    %30 = vector.broadcast %5 : vector<3x1x1xf32> to vector<3x8x256xf32>
    %31 = arith.mulf %13, %30 : vector<3x8x256xf32>
    %32 = arith.select %29, %31, %27 : vector<3x8x256xi1>, vector<3x8x256xf32>
    %c3_i32 = arith.constant 3 : i32
    %33 = vector.broadcast %c3_i32 : i32 to vector<3x8x256xi32>
    %34 = arith.cmpi eq, %7, %33 : vector<3x8x256xi32>
    %35 = vector.broadcast %6 : vector<3x1x1xf32> to vector<3x8x256xf32>
    %36 = arith.mulf %13, %35 : vector<3x8x256xf32>
    %37 = arith.select %34, %36, %32 : vector<3x8x256xi1>, vector<3x8x256xf32>
    %c4_i32 = arith.constant 4 : i32
    %38 = vector.broadcast %c4_i32 : i32 to vector<3x8x256xi32>
    %39 = arith.cmpi eq, %7, %38 : vector<3x8x256xi32>
    %40 = arith.select %39, %12, %37 : vector<3x8x256xi1>, vector<3x8x256xf32>
    %c0_10 = arith.constant 0 : index
    %c0_11 = arith.constant 0 : index
    %c0_12 = arith.constant 0 : index
    %41 = vector.load %arg5[%c0_10, %c0_11, %c0_12] : memref<3x8x256xf32, #tpu.memory_space<vmem>>, vector<3x8x256xf32>
    tpu.vector_store %arg5[%c0_10, %c0_11, %c0_12], %40 {strides = array<i32>} : memref<3x8x256xf32, #tpu.memory_space<vmem>>, vector<3x8x256xf32>,
    return
  }
  func.func @transform_0(%arg0: i32, %arg1: i32) -> (i32, i32, i32) {
    %c0_i32 = arith.constant 0 : i32
    %c0_i32_0 = arith.constant 0 : i32
    return %arg1, %c0_i32, %arg0 : i32, i32, i32
  }
  func.func @transform_1(%arg0: i32, %arg1: i32) -> (i32, i32, i32) {
    %c0_i32 = arith.constant 0 : i32
    %c0_i32_0 = arith.constant 0 : i32
    %c0_i32_1 = arith.constant 0 : i32
    return %c0_i32, %c0_i32_0, %arg0 : i32, i32, i32
  }
  func.func @transform_2(%arg0: i32, %arg1: i32) -> (i32, i32, i32) {
    %c0_i32 = arith.constant 0 : i32
    %c0_i32_0 = arith.constant 0 : i32
    %c0_i32_1 = arith.constant 0 : i32
    return %arg1, %c0_i32, %c0_i32_0 : i32, i32, i32
  }
  func.func @transform_3(%arg0: i32, %arg1: i32) -> (i32, i32, i32) {
    %c0_i32 = arith.constant 0 : i32
    %c0_i32_0 = arith.constant 0 : i32
    return %arg1, %c0_i32, %arg0 : i32, i32, i32
  }
}

</mosaic_0001>

<bundles_post_ra>
// kernel: _lambda_.1
= control target key start
LH: loop header
LB: loop body
LE: loop exit
PB: predicated region body
PF: predicated region fallthrough
CT: control target
= control target key end

     0   :  { %s827_s12 = smov 0   ;;  %s829_s13 = smov 0   ;;  %s1224_s0 = inlined_call_operand.vmem [shape: f32[6,9,256], index: 0, kind: input, shape index: {}, may-alias: {0,3}]   ;;  %s1225_s1 = inlined_call_operand.vmem [shape: f32[1,2,256], index: 1, kind: input, shape index: {}]   ;;  %s1226_s2 = inlined_call_operand.vmem [shape: f32[6,2,1], index: 2, kind: input, shape index: {}]   ;;  %s1227_s3 = inlined_call_operand.vmem [shape: f32[6,9,256], index: 3, kind: output, shape index: {}, may-alias: {0,3}]  }
   0x1   :  { %s831_s14 = smov 0   ;;  %s833_s15 = smov 0  }
   0x2   :  { %s835_s16 = smov 0  }
   0x3 LB: > { %s22_s17 = sadd.s32 1, %s801_s15  ;;  %s652_s18 = sadd.s32 4294967295, %s805_s16   ;;  %s805_s16 = sphi %s835_s16, %s13_s16   ;;  %s801_s15 = sphi %s833_s15, %s1250_s15   ;;  %s797_s14 = sphi %s831_s14, %s1249_s14   ;;  %s793_s13 = sphi %s829_s13, %s1248_s13   ;;  %s789_s12 = sphi %s827_s12, %s1247_s12  }
   0x4   : > { %p23_p0 = scmp.ge.s32.totalorder %s22_s17, 2  ;;  %p41_p1 = scmp.ne.s32.totalorder %s793_s13, %s789_s12 }
   0x5   : > { %p42_p2 = scmp.eq.s32.totalorder %s805_s16, 0  ;;  %p125_p4 = scmp.eq.s32.totalorder %s652_s18, 1 }
   0x6   : > { %s1252_s17 = smov (%p23_p0, %s22_s17), 0  ;;  %s34_s20 = sadd.s32 1, %s793_s13 }
   0x7   : > { %p43_p3 = por %p42_p2, %p41_p1  ;;  %s29_s19 = ssub.s32 %s801_s15, %s1252_s17 }
   0x8   : > { %p32_p5 = scmp.eq.s32.totalorder %s29_s19, 0  ;;  %p862_p6 = por %p125_p4, %p41_p1 }
   0x9   : > { %p656_p7 = scmp.ge.s32.totalorder %s805_s16, 2 }
   0xa   : > { %s867_s22 = scalar_select %p32_p5, %s793_s13, %s34_s20  }
   0xb   : > { %156 = sbr.rel (%p656_p7) target bundleno = 27 (0x1b), region = 20 }
  0x10   : > { %159 = sbr.rel (!%p43_p3) target bundleno = 27 (0x1b), region = 24  ;;  %s161_s23 = sand.u32 (%p43_p3), 1, %s793_s13  }
  0x11   : > { %s675_s24 = smul.u32 (%p43_p3), 96, %s801_s15 }
  0x12   : > { %s677_s25 = smul.u32 (%p43_p3), 48, %s161_s23 }
  0x13   : > { %s169_s28 = scalar_lea.vmem (%p43_p3), %s1224_s0, %s675_s24 }
  0x14   : > { %v182_v0 = vld [vmem:[%s169_s28] sm:$0xff] (%p43_p3)  ;;  %v184_v1 = vld [vmem:[%s169_s28 + $0x8] sm:$0xff] (%p43_p3)  ;;  %s163_s29 = scalar_lea.vmem (%p43_p3), [#allocation2], %s677_s25 }
  0x15   : > { %v186_v2 = vld [vmem:[%s169_s28 + $0x20] sm:$0xff]  ;;  %183 = vst [vmem:[%s163_s29] sm:$0xff] %v182_v0  ;;  %v188_v3 = vld [vmem:[%s169_s28 + $0x28] sm:$0xff] }
  0x16   : > { %185 = vst [vmem:[%s163_s29 + $0x8] sm:$0xff] %v184_v1  ;;  %v190_v4 = vld [vmem:[%s169_s28 + $0x40] sm:$0xff]  ;;  %v192_v5 = vld [vmem:[%s169_s28 + $0x48] sm:$0xff] }
  0x17   : > { %187 = vst [vmem:[%s163_s29 + $0x10] sm:$0xff] %v186_v2 }
  0x18   : > { %189 = vst [vmem:[%s163_s29 + $0x18] sm:$0xff] %v188_v3 }
  0x19   : > { %191 = vst [vmem:[%s163_s29 + $0x20] sm:$0xff] %v190_v4 }
  0x1a   : > { %193 = vst [vmem:[%s163_s29 + $0x28] sm:$0xff] %v192_v5 }
  0x1b PF: > { %p659_p8 = scmp.ge.s32.totalorder %s805_s16, 1  ;;  %p207_p9 = scmp.lt.s32.totalorder %s805_s16, 3 }
  0x1d   : > { %p208_p10 = pnand %p659_p8, %p207_p9 }
  0x1e   : > { %s254_s30 = smul.u32 (!%p208_p10), 3, %s797_s14  ;;  %s214_s4 = sand.u32 (!%p208_p10), 1, %s789_s12  }
  0x1f   : > { %211 = sbr.rel (%p208_p10) target bundleno = 113 (0x71), region = 51 }
  0x20   : > { %s879_s5 = smul.u32 (!%p208_p10), 48, %s214_s4  ;;  %p255_p11 = scmp.lt.s32.totalorder (!%p208_p10), %s254_s30, 5 }
  0x22   : > { %s882_s6 = scalar_lea.vmem (!%p208_p10), [#allocation2], %s879_s5  ;;  %s245_s26 = scalar_lea.vmem (!%p208_p10), [#allocation3], %s879_s5 }
  0x24   : > { %s1254_s30 = smov (!%p255_p11, %s254_s30), 5  ;;  %v885_v6 = vld [vmem:[%s882_s6] sm:$0xff]  ;;  %v888_v7 = vld [vmem:[%s882_s6 + $0x8] sm:$0xff]  ;;  %v891_v8 = vld [vmem:[%s882_s6 + $0x10] sm:$0xff]  ;;  %v272_v35 = vlaneseq  ;;  %s676_s27 = smul.u32 (%p862_p6), 96, %s797_s14 }
  0x25   : > { %v661_v9 = vmul.f32 -1.442695, %v885_v6  ;;  %v662_v10 = vmul.f32 -1.442695, %v888_v7  ;;  %s660_s7 = sshll.u32 %s1254_s30, 1  ;;  %v899_v11 = vld [vmem:[%s882_s6 + $0x18] sm:$0xff] }
  0x26   : > { %s258_s10 = scalar_lea.vmem %s1226_s2, %s660_s7  ;;  %v663_v12 = vmul.f32 -1.442695, %v891_v8  ;;  %v903_v13 = vld [vmem:[%s882_s6 + $0x20] sm:$0xff]  ;;  %v664_v20 = vmul.f32 -1.442695, %v899_v11  ;;  %v924_v32 = vld [vmem:[%s882_s6 + $0x28] sm:$0xff]  ;;  %s526_s30 = scalar_lea.vmem (%p862_p6), %s1227_s3, %s676_s27 }
  0x27   : > { %731 = vpow2.f32 %v661_v9  ;;  %v269_v14 = vld [vmem:[%s258_s10] sm:$0x3]  ;;  %v270_v15 = vld [vmem:[%s258_s10 + $0x2] sm:$0x3]  ;;  %v271_v16 = vld [vmem:[%s258_s10 + $0x4] sm:$0x3] }
  0x28   : > { %733 = vpow2.f32 %v662_v10  ;;  %679 = vpush %v269_v14  ;;  %v477_v17 = vrot.slane %v269_v14, 1  ;;  %v478_v18 = vrot.slane %v270_v15, 1  ;;  %v479_v19 = vrot.slane %v271_v16, 1  ;;  %v920_v31 = vld [vmem:[%s1225_s1] sm:$0xf] }
  0x29   : > { %681 = vpush %v270_v15  ;;  %735 = vpow2.f32 %v663_v12  ;;  %v665_v21 = vmul.f32 -1.442695, %v903_v13  ;;  %v402_v37 = vperm.slane %v920_v31, 0  ;;  %v403_v38 = vperm.slane %v920_v31, 2 }
  0x2a   : > { %683 = vpush %v271_v16  ;;  %737 = vpow2.f32 %v664_v20  ;;  %v666_v39 = vmul.f32 -1.442695, %v924_v32  ;;  %v943_v43 = vshrl.u32 %v272_v35, 7  ;;  %v388_v51 = vmul.f32 1.442695, %v885_v6 }
  0x2b   : > { %685 = vpush %v477_v17  ;;  %739 = vpow2.f32 %v665_v21  ;;  %v947_v45 = vperm.slane %v402_v37, 0  ;;  %v949_v46 = vperm.slane %v403_v38, 0  ;;  %v960_v54 = vmul.f32 1.442695, %v888_v7 }
  0x2c   : > { %687 = vpush %v478_v18  ;;  %v427_v57 = vperm.slane %v920_v31, 1  ;;  %v428_v58 = vperm.slane %v920_v31, 3  ;;  %v396_v3 = vmul.f32 1.442695, %v903_v13  ;;  %v398_v12 = vmul.f32 1.442695, %v924_v32 }
  0x2d   : > { %v732_v22 = vpop.eup %731  ;;  %689 = vpush %v479_v19 }
  0x2e   : > { %v734_v23 = vpop.eup %733  ;;  %v907_v24 = vadd.f32 1.0, %v732_v22 }
  0x2f   : > { %v909_v25 = vadd.f32 1.0, %v734_v23  ;;  %v736_v26 = vpop.eup %735 }
  0x30   : > { %741 = vrcp.f32 %v907_v24  ;;  %v738_v27 = vpop.eup %737  ;;  %v913_v28 = vadd.f32 1.0, %v736_v26  ;;  %v307_v53 = vand.u32 2147483647, %v907_v24  ;;  %vm303_vm0 = vweird.f32 %v907_v24 }
  0x31   : > { %743 = vrcp.f32 %v909_v25  ;;  %v740_v29 = vpop.eup %739  ;;  %v915_v30 = vadd.f32 1.0, %v738_v27  ;;  %v309_v60 = vand.u32 2147483648, %v907_v24  ;;  %vm318_vm1 = vweird.f32 %v909_v25 }
  0x32   : > { %745 = vrcp.f32 %v913_v28  ;;  %v926_v33 = vadd.f32 1.0, %v740_v29  ;;  %v322_v61 = vand.u32 2147483647, %v909_v25  ;;  %v324_v1 = vand.u32 2147483648, %v909_v25 }
  0x33   : > { %747 = vrcp.f32 %v915_v30  ;;  %vm974_vm3 = vcmp.eq.f32.partialorder %v307_v53, 8.507059e+37  ;;  %vm333_vm5 = vweird.f32 %v913_v28  ;;  %v339_v9 = vand.u32 2147483648, %v913_v28 }
  0x34   : > { %749 = vrcp.f32 %v926_v33  ;;  %v354_v10 = vand.u32 2147483648, %v915_v30  ;;  %v337_v14 = vand.u32 2147483647, %v913_v28  ;;  %vm348_vm8 = vweird.f32 %v915_v30 }
  0x35   : > { %751 = vpow2.f32 %v666_v39  ;;  %v352_v19 = vand.u32 2147483647, %v915_v30  ;;  %vm363_vm12 = vweird.f32 %v926_v33  ;;  %vm1016_vm14 = vcmp.eq.f32.partialorder %v322_v61, 8.507059e+37 }
  0x36   : > { %v929_v34 = vpop.eup %741  ;;  %v325_v26 = vor.u32 1.1754944e-38, %v324_v1  ;;  %v340_v27 = vor.u32 1.1754944e-38, %v339_v9  ;;  %v355_v31 = vor.u32 1.1754944e-38, %v354_v10  ;;  %v367_v37 = vand.u32 2147483647, %v926_v33 }
  0x37   : > { %v932_v36 = vpop.eup %743  ;;  %v299_v40 = vmul.f32 %v929_v34, %v907_v24  ;;  %vm304_vm2 = vweird.f32 %v929_v34  ;;  %v310_v24 = vor.u32 1.1754944e-38, %v309_v60  ;;  %v392_v39 = vmul.f32 1.442695, %v891_v8 }
  0x38   : > { %v314_v41 = vmul.f32 %v932_v36, %v909_v25  ;;  %v941_v42 = vpop.eup %745  ;;  %vm319_vm4 = vweird.f32 %v932_v36  ;;  %vm987_vm7 = vmor %vm303_vm0, %vm304_vm2  ;;  %vm1028_vm0 = vcmp.eq.f32.partialorder %v337_v14, 8.507059e+37  ;;  %vm353_vm2 = vcmp.eq.f32.partialorder %v352_v19, 8.507059e+37 }
  0x39   : > { %v945_v44 = vpop.eup %747  ;;  %v329_v47 = vmul.f32 %v941_v42, %v913_v28  ;;  %v300_v49 = vsub.f32 1.0, %v299_v40  ;;  %vm334_vm6 = vweird.f32 %v941_v42  ;;  %vm999_vm10 = vmor %vm318_vm1, %vm319_vm4  ;;  %v369_v40 = vand.u32 2147483648, %v926_v33 }
  0x3a   : > { %v953_v48 = vpop.eup %749  ;;  %v315_v50 = vsub.f32 1.0, %v314_v41  ;;  %v344_v52 = vmul.f32 %v945_v44, %v915_v30  ;;  %vm349_vm9 = vweird.f32 %v945_v44  ;;  %vm1009_vm11 = vmor %vm333_vm5, %vm334_vm6  ;;  %vm368_vm4 = vcmp.eq.f32.partialorder %v367_v37, 8.507059e+37 }
  0x3b   : > { %v330_v55 = vsub.f32 1.0, %v329_v47  ;;  %v359_v56 = vmul.f32 %v953_v48, %v926_v33  ;;  %v301_v63 = vmul.f32 %v929_v34, %v300_v49  ;;  %v752_v2 = vpop.eup %751  ;;  %vm364_vm13 = vweird.f32 %v953_v48  ;;  %vm1024_vm15 = vmor %vm348_vm8, %vm349_vm9 }
  0x3c   : > { %v345_v59 = vsub.f32 1.0, %v344_v52  ;;  %v316_v0 = vmul.f32 %v932_v36, %v315_v50  ;;  %v1004_v20 = vadd.f32 1.0, %v752_v2  ;;  %vm1038_vm1 = vmor %vm363_vm12, %vm364_vm13  ;;  %v431_v49 = vperm.slane %v427_v57, 1 }
  0x3d   : > { %v360_v62 = vsub.f32 1.0, %v359_v56  ;;  %v331_v4 = vmul.f32 %v941_v42, %v330_v55  ;;  %v302_v16 = vadd.f32 %v929_v34, %v301_v63  ;;  %v394_v50 = vmul.f32 1.442695, %v899_v11 }
  0x3e   : > { %v346_v5 = vmul.f32 %v945_v44, %v345_v59  ;;  %v317_v17 = vadd.f32 %v932_v36, %v316_v0  ;;  %753 = vrcp.f32 %v1004_v20  ;;  %v370_v33 = vor.u32 1.1754944e-38, %v369_v40 }
  0x3f   : > { %v361_v15 = vmul.f32 %v953_v48, %v360_v62  ;;  %v332_v21 = vadd.f32 %v941_v42, %v331_v4  ;;  %v306_v38 = vsel %vm987_vm7, %v929_v34, %v302_v16  ;;  %755 = vpow2.f32 %v388_v51 }
  0x40   : > { %v347_v23 = vadd.f32 %v945_v44, %v346_v5  ;;  %v321_v41 = vsel %vm999_vm10, %v932_v36, %v317_v17  ;;  %v1056_v52 = vsel %vm974_vm3, %v310_v24, %v306_v38  ;;  %757 = vpow2.f32 %v960_v54 }
  0x41   : > { %v362_v35 = vadd.f32 %v953_v48, %v361_v15  ;;  %v336_v47 = vsel %vm1009_vm11, %v941_v42, %v332_v21  ;;  %v1064_v42 = vsel %vm1016_vm14, %v325_v26, %v321_v41  ;;  %vm400_vm3 = vcmp.eq.s32.totalorder %v943_v43, 0 }
  0x42   : > { %v351_v34 = vsel %vm1024_vm15, %v945_v44, %v347_v23  ;;  %v432_v44 = vperm.slane %v428_v58, 1  ;;  %v1068_v51 = vsel %vm1028_vm0, %v340_v27, %v336_v47  ;;  %759 = vpow2.f32 %v392_v39 }
  0x43   : > { %v366_v36 = vsel %vm1038_vm1, %v953_v48, %v362_v35  ;;  %v1070_v53 = vsel %vm353_vm2, %v355_v31, %v351_v34  ;;  %v408_v55 = vadd.f32 %v947_v45, %v1056_v52  ;;  %vm426_vm5 = vcmp.eq.s32.totalorder %v943_v43, 1 }
  0x44   : > { %v754_v54 = vpop.eup %753  ;;  %v433_v48 = vadd.f32 %v431_v49, %v1056_v52  ;;  %761 = vpow2.f32 %v394_v50  ;;  %v1077_v56 = vsel %vm368_vm4, %v370_v33, %v366_v36  ;;  %v409_v57 = vadd.f32 %v949_v46, %v1064_v42 }
  0x45   : > { %v410_v58 = vadd.f32 %v947_v45, %v1068_v51  ;;  %v411_v59 = vadd.f32 %v949_v46, %v1070_v53  ;;  %v374_v60 = vmul.f32 %v754_v54, %v1004_v20  ;;  %v1086_v61 = vpop.eup %755  ;;  %v434_v62 = vadd.f32 %v432_v44, %v1064_v42 }
  0x46   : > { %vm378_vm6 = vweird.f32 %v1004_v20  ;;  %v382_v63 = vand.u32 2147483647, %v1004_v20  ;;  %v384_v0 = vand.u32 2147483648, %v1004_v20  ;;  %v1092_v1 = vpop.eup %757  ;;  %vm379_vm7 = vweird.f32 %v754_v54 }
  0x47   : > { %v375_v2 = vsub.f32 1.0, %v374_v60  ;;  %v412_v4 = vadd.f32 %v947_v45, %v1077_v56  ;;  %v414_v5 = vmul.f32 32.0, %v408_v55  ;;  %v435_v9 = vadd.f32 %v431_v49, %v1068_v51  ;;  %vm1107_vm8 = vmor %vm378_vm6, %vm379_vm7 }
  0x48   : > { %v436_v10 = vadd.f32 %v432_v44, %v1070_v53  ;;  %v1100_v14 = vpop.eup %759  ;;  %v415_v15 = vmul.f32 32.0, %v409_v57  ;;  %v416_v16 = vmul.f32 32.0, %v410_v58  ;;  %v417_v17 = vmul.f32 32.0, %v411_v59 }
  0x49   : > { %v376_v18 = vmul.f32 %v754_v54, %v375_v2  ;;  %v439_v21 = vmul.f32 32.0, %v433_v48  ;;  %v440_v22 = vmul.f32 32.0, %v434_v62  ;;  %v385_v23 = vor.u32 1.1754944e-38, %v384_v0 }
  0x4a   : > { %v1102_v19 = vpop.eup %761  ;;  %v437_v24 = vadd.f32 %v431_v49, %v1077_v56  ;;  %vm383_vm9 = vcmp.eq.f32.partialorder %v382_v63, 8.507059e+37  ;;  %763 = vpow2.f32 %v396_v3  ;;  %v418_v26 = vmul.f32 32.0, %v412_v4 }
  0x4b   : > { %v377_v25 = vadd.f32 %v754_v54, %v376_v18  ;;  %v420_v27 = vsel %vm400_vm3, %v414_v5, %v885_v6  ;;  %v441_v28 = vmul.f32 32.0, %v435_v9  ;;  %v442_v29 = vmul.f32 32.0, %v436_v10 }
  0x4c   : > { %765 = vpow2.f32 %v398_v12  ;;  %v421_v20 = vsel %vm400_vm3, %v415_v15, %v888_v7  ;;  %v422_v31 = vsel %vm400_vm3, %v416_v16, %v891_v8  ;;  %v423_v35 = vsel %vm400_vm3, %v417_v17, %v899_v11 }
  0x4d   : > { %v381_v37 = vsel %vm1107_vm8, %v754_v54, %v377_v25  ;;  %vm451_vm10 = vcmp.eq.s32.totalorder %v943_v43, 2  ;;  %v443_v38 = vmul.f32 32.0, %v437_v24  ;;  %v445_v39 = vsel %vm426_vm5, %v439_v21, %v420_v27 }
  0x4e   : > { %v1127_v6 = vsel %vm383_vm9, %v385_v23, %v381_v37  ;;  %v424_v8 = vsel %vm400_vm3, %v418_v26, %v903_v13  ;;  %v446_v30 = vsel %vm426_vm5, %v440_v22, %v421_v20  ;;  %v447_v40 = vsel %vm426_vm5, %v441_v28, %v422_v31 }
  0x4f   : > { %v413_v7 = vadd.f32 %v949_v46, %v1127_v6  ;;  %v438_v11 = vadd.f32 %v432_v44, %v1127_v6  ;;  %v448_v41 = vsel %vm426_vm5, %v442_v29, %v423_v35  ;;  %vm476_vm11 = vcmp.eq.s32.totalorder %v943_v43, 3 }
  0x50   : > { %v764_v47 = vpop.eup %763  ;;  %vm501_vm12 = vcmp.eq.s32.totalorder %v943_v43, 4  ;;  %v449_v44 = vsel %vm426_vm5, %v443_v38, %v424_v8 }
  0x51   : > { %v419_v34 = vmul.f32 32.0, %v413_v7  ;;  %v444_v49 = vmul.f32 32.0, %v438_v11 }
  0x52   : > { %v766_v13 = vpop.eup %765 }
  0x53   : > { %v425_v48 = vsel %vm400_vm3, %v419_v34, %v924_v32 }
  0x54   : > { %v450_v60 = vsel %vm426_vm5, %v444_v49, %v425_v48 }
  0x59   : > { %s680_s18 = spop %679 }
  0x5a   : > { %v454_v46 = vstv %s680_s18  ;;  %s682_s19 = spop %681 }
  0x5b   : > { %v464_v50 = vmul.f32 %v1086_v61, %v454_v46  ;;  %v465_v33 = vmul.f32 %v1092_v1, %v454_v46  ;;  %v458_v36 = vstv %s682_s19  ;;  %s684_s20 = spop %683 }
  0x5c   : > { %v466_v54 = vmul.f32 %v1100_v14, %v458_v36  ;;  %v467_v55 = vmul.f32 %v1102_v19, %v458_v36  ;;  %v462_v57 = vstv %s684_s20  ;;  %s686_s23 = spop %685 }
  0x5d   : > { %v470_v58 = vsel %vm451_vm10, %v464_v50, %v445_v39  ;;  %v471_v59 = vsel %vm451_vm10, %v465_v33, %v446_v30  ;;  %v468_v62 = vmul.f32 %v764_v47, %v462_v57  ;;  %s688_s24 = spop %687  ;;  %v469_v32 = vmul.f32 %v766_v13, %v462_v57 }
  0x5e   : > { %v472_v63 = vsel %vm451_vm10, %v466_v54, %v447_v40  ;;  %v473_v0 = vsel %vm451_vm10, %v467_v55, %v448_v41  ;;  %v481_v2 = vstv %s686_s23  ;;  %s690_s25 = spop %689  ;;  %v484_v9 = vstv %s688_s24 }
  0x5f   : > { %v474_v3 = vsel %vm451_vm10, %v468_v62, %v449_v44  ;;  %v489_v4 = vmul.f32 %v1086_v61, %v481_v2  ;;  %v490_v5 = vmul.f32 %v1092_v1, %v481_v2  ;;  %v475_v10 = vsel %vm451_vm10, %v469_v32, %v450_v60 }
  0x60   : > { %v491_v12 = vmul.f32 %v1100_v14, %v484_v9  ;;  %v492_v15 = vmul.f32 %v1102_v19, %v484_v9  ;;  %v487_v16 = vstv %s690_s25 }
  0x61   : > { %v495_v17 = vsel %vm476_vm11, %v489_v4, %v470_v58  ;;  %v496_v18 = vsel %vm476_vm11, %v490_v5, %v471_v59  ;;  %v493_v21 = vmul.f32 %v764_v47, %v487_v16  ;;  %v494_v22 = vmul.f32 %v766_v13, %v487_v16 }
  0x62   : > { %v502_v61 = vsel %vm501_vm12, %v1056_v52, %v495_v17  ;;  %v503_v1 = vsel %vm501_vm12, %v1064_v42, %v496_v18  ;;  %v497_v14 = vsel %vm476_vm11, %v491_v12, %v472_v63  ;;  %v498_v19 = vsel %vm476_vm11, %v492_v15, %v473_v0 }
  0x63   : > { %508 = vst [vmem:[%s245_s26] sm:$0xff] %v502_v61  ;;  %v504_v45 = vsel %vm501_vm12, %v1068_v51, %v497_v14  ;;  %v505_v52 = vsel %vm501_vm12, %v1070_v53, %v498_v19  ;;  %v499_v23 = vsel %vm476_vm11, %v493_v21, %v474_v3  ;;  %v500_v42 = vsel %vm476_vm11, %v494_v22, %v475_v10 }
  0x64   : > { %509 = vst [vmem:[%s245_s26 + $0x8] sm:$0xff] %v503_v1  ;;  %v506_v24 = vsel %vm501_vm12, %v1077_v56, %v499_v23  ;;  %v507_v51 = vsel %vm501_vm12, %v1127_v6, %v500_v42  ;;  %520 = sbr.rel (!%p862_p6) target bundleno = 113 (0x71), region = 59 }
  0x65   : > { %510 = vst [vmem:[%s245_s26 + $0x10] sm:$0xff] %v504_v45 }
  0x66   : > { %511 = vst [vmem:[%s245_s26 + $0x18] sm:$0xff] %v505_v52 }
  0x67   : > { %512 = vst [vmem:[%s245_s26 + $0x20] sm:$0xff] %v506_v24 }
  0x68   : > { %513 = vst [vmem:[%s245_s26 + $0x28] sm:$0xff] %v507_v51 }
  0x6a   : > { %v539_v53 = vld [vmem:[%s245_s26] sm:$0xff] }
  0x6b   : > { %v541_v25 = vld [vmem:[%s245_s26 + $0x8] sm:$0xff]  ;;  %540 = vst [vmem:[%s526_s30] sm:$0xff] %v539_v53 }
  0x6c   : > { %v543_v56 = vld [vmem:[%s245_s26 + $0x10] sm:$0xff]  ;;  %542 = vst [vmem:[%s526_s30 + $0x8] sm:$0xff] %v541_v25 }
  0x6d   : > { %v545_v26 = vld [vmem:[%s245_s26 + $0x18] sm:$0xff]  ;;  %544 = vst [vmem:[%s526_s30 + $0x20] sm:$0xff] %v543_v56 }
  0x6e   : > { %v547_v43 = vld [vmem:[%s245_s26 + $0x20] sm:$0xff]  ;;  %546 = vst [vmem:[%s526_s30 + $0x28] sm:$0xff] %v545_v26 }
  0x6f   : > { %v549_v27 = vld [vmem:[%s245_s26 + $0x28] sm:$0xff]  ;;  %548 = vst [vmem:[%s526_s30 + $0x40] sm:$0xff] %v547_v43 }
  0x70   : > { %550 = vst [vmem:[%s526_s30 + $0x48] sm:$0xff] %v549_v27 }
  0x71 PF: > { %s13_s16 = sadd.s32 1, %s805_s16   ;;  %s1247_s12 = smov %s793_s13 }
  0x72   : > { %p10_p12 = scmp.ge.s32.totalorder %s13_s16, 4   ;;  %s1248_s13 = smov %s867_s22 }
  0x73   : > { %s1249_s14 = smov %s801_s15  ;;  %s1250_s15 = smov %s1252_s17 }
  0x74   :  { %12 = sbr.rel (!%p10_p12) target bundleno = 3 (0x3), region = 119 }

</bundles_post_ra>
